<compile_context>
chip_gen: v5e
topology: v5e:2x2
jax: 0.10.0
libtpu: 0.0.40
codegen_flags: <defaults>
</compile_context>

<pallas_src>
import math
from functools import partial

import jax
import jax.numpy as jnp
from jax.experimental import pallas as pl
from jax.experimental.pallas import tpu as pltpu

EPS = 1e-5


# ---------------------------------------------------------------------------
# Fused kernel: conv1 + ReLU + BatchNorm(batch stats) + conv2 + ReLU
# ---------------------------------------------------------------------------
def fused_block_kernel(x_ref, w1_ref, b1_ref, sel_ref, g_ref, bt_ref,
                       w2_ref, b2_ref, y_ref, pad1_ref, pad2_ref, *,
                       inv_count):
    # x_ref:    (N, H, W*Cin)        f32   lane-dense NHWC activations
    # w1_ref:   (3, W*Cin, W*Cout)   cdt   banded conv1 weight (per dy)
    # b1_ref:   (1, W*Cout)          f32   conv1 bias tiled over W
    # sel_ref:  (W*Cout, W*Cout)     f32   sel[i,j] = (i%Cout == j%Cout)
    # g_ref:    (1, W*Cout)          f32   gamma tiled over W
    # bt_ref:   (1, W*Cout)          f32   beta tiled over W
    # w2_ref:   (3, W*Cout, W*Cout)  cdt   banded conv2 weight (per dy)
    # b2_ref:   (1, W*Cout)          f32   conv2 bias tiled over W
    # y_ref:    (N, H, W*Cout)       f32   output
    # pad1_ref: (N, H+2, W*Cin)      f32   scratch: row-padded conv1 input
    # pad2_ref: (N, H+2, W*Cout)     f32   scratch: row-padded BN output
    N, H, WCin = x_ref.shape
    WCout = y_ref.shape[2]
    NH = N * H
    f32 = jnp.float32
    cdt = w1_ref.dtype                      # MXU compute dtype (f32 or bf16)

    # ---- conv1: zero only the per-image top/bottom halo rows (left/right
    # padding is folded into the banded weight), then 3 banded MXU matmuls
    # over all N*H rows at once. ----
    pad1_ref[:, 0:1, :] = jnp.zeros((N, 1, WCin), f32)
    pad1_ref[:, H + 1:H + 2, :] = jnp.zeros((N, 1, WCin), f32)
    pad1_ref[:, 1:H + 1, :] = x_ref[...]

    acc1 = jnp.dot(pad1_ref[:, 0:H, :].reshape(NH, WCin).astype(cdt),
                   w1_ref[0], preferred_element_type=f32)
    for dy in (1, 2):
        acc1 = acc1 + jnp.dot(
            pad1_ref[:, dy:dy + H, :].reshape(NH, WCin).astype(cdt),
            w1_ref[dy], preferred_element_type=f32)
    h = jnp.maximum(acc1 + b1_ref[...], 0.0)          # (N*H, W*Cout) f32

    # ---- BatchNorm (training-mode batch statistics), fully in-kernel.
    # Column sums over all rows, then the precomputed selector matmul both
    # folds W -> Cout and re-broadcasts the per-channel totals over W, keeping
    # everything 128-lane dense. ----
    sum_t = jnp.dot(jnp.sum(h, axis=0, keepdims=True), sel_ref[...],
                    preferred_element_type=f32)        # (1, W*Cout)
    sq_t = jnp.dot(jnp.sum(h * h, axis=0, keepdims=True), sel_ref[...],
                   preferred_element_type=f32)         # (1, W*Cout)
    mean = sum_t * inv_count
    var = jnp.maximum(sq_t * inv_count - mean * mean, 0.0)   # biased variance
    scale = g_ref[...] * jax.lax.rsqrt(var + EPS)             # EUP rsqrt
    shift = bt_ref[...] - mean * scale

    # ---- conv2 on the BN-affine'd activations + bias + ReLU ----
    pad2_ref[:, 0:1, :] = jnp.zeros((N, 1, WCout), f32)
    pad2_ref[:, H + 1:H + 2, :] = jnp.zeros((N, 1, WCout), f32)
    pad2_ref[:, 1:H + 1, :] = (h * scale + shift).reshape(N, H, WCout)

    acc2 = jnp.dot(pad2_ref[:, 0:H, :].reshape(NH, WCout).astype(cdt),
                   w2_ref[0], preferred_element_type=f32)
    for dy in (1, 2):
        acc2 = acc2 + jnp.dot(
            pad2_ref[:, dy:dy + H, :].reshape(NH, WCout).astype(cdt),
            w2_ref[dy], preferred_element_type=f32)

    y_ref[...] = jnp.maximum(acc2 + b2_ref[...], 0.0).reshape(N, H, WCout)


# ---------------------------------------------------------------------------
# One-time (per parameter set) preparation — hoisted out of the forward path
# ---------------------------------------------------------------------------
def _band_weight(w_hwio, W):
    """Fold the 3 horizontal taps + left/right zero padding of a 3x3 conv into
    a per-kernel-row banded matrix: band[dy, win*Cin + ci, wout*Cout + co]."""
    KH, KW, Cin, Cout = w_hwio.shape
    # E[dx, win, wout] = 1  iff  win == wout + dx - 1  (valid input column)
    E = jnp.stack([jnp.eye(W, k=1 - dx, dtype=w_hwio.dtype) for dx in range(KW)])
    band = jnp.einsum('xvw,yxio->yviwo', E, w_hwio)       # (KH, W, Cin, W, Cout)
    return band.reshape(KH, W * Cin, W * Cout)


def _tile_channels(v, W):
    """(Cout,) -> (1, W*Cout) with element [0, w*Cout + c] = v[c]."""
    Cout = v.shape[-1]
    return jnp.tile(v.reshape(1, Cout), (1, W))


def prepare_block(params, W, *, compute_dtype=jnp.float32):
    """Precompute banded weights / tiled vectors / selector ONCE per param set
    (they do not get re-derived inside the jitted forward)."""
    Cout = params["w1"].shape[-1]
    idx = jnp.arange(W * Cout)
    sel = (idx[:, None] % Cout == idx[None, :] % Cout).astype(jnp.float32)
    return {
        "w1b": _band_weight(params["w1"], W).astype(compute_dtype),
        "w2b": _band_weight(params["w2"], W).astype(compute_dtype),
        "b1r": _tile_channels(params["b1"], W),
        "b2r": _tile_channels(params["b2"], W),
        "gr": _tile_channels(params["gamma"], W),
        "btr": _tile_channels(params["beta"], W),
        "sel": sel,
    }


def _nbytes(shape, dtype):
    return math.prod(shape) * jnp.dtype(dtype).itemsize


# ---------------------------------------------------------------------------
# Forward (jit-able): NCHW in, NCHW out (matches PyTorch Block.forward)
# ---------------------------------------------------------------------------
def block_forward(x_nchw, prep):
    x = jnp.transpose(x_nchw, (0, 2, 3, 1)).astype(jnp.float32)  # NCHW -> NHWC
    N, H, W, Cin = x.shape
    WCin = W * Cin
    WCout = prep["b1r"].shape[-1]
    Cout = WCout // W
    cdt = prep["w1b"].dtype
    f32 = jnp.float32

    x2 = x.reshape(N, H, WCin)               # free: NHWC is contiguous

    # Explicit VMEM budget from the real block footprint (8x headroom for
    # pipeline buffers + compiler temporaries), clamped to 48 MiB so it stays
    # safe on v7x's 64 MiB/TC (v5e/v6e have 128 MiB and could go higher).
    footprint = (_nbytes((N, H, WCin), f32)
                 + _nbytes((3, WCin, WCout), cdt)
                 + _nbytes((3, WCout, WCout), cdt)
                 + _nbytes((WCout, WCout), f32)
                 + 4 * _nbytes((1, WCout), f32)
                 + _nbytes((N, H, WCout), f32)
                 + _nbytes((N, H + 2, WCin), f32)
                 + _nbytes((N, H + 2, WCout), f32))
    vmem = int(min(max(8 * footprint, 4 * 1024 * 1024), 48 * 1024 * 1024))

    # NOTE: constant-index inputs (weights/biases/sel) get the default
    # pipelining; with a single grid step the duplicate buffer cost is nil.
    y = pl.pallas_call(
        partial(fused_block_kernel, inv_count=1.0 / float(N * H * W)),
        out_shape=jax.ShapeDtypeStruct((N, H, WCout), f32),
        grid=(1,),
        in_specs=[
            pl.BlockSpec((N, H, WCin), lambda i: (0, 0, 0)),
            pl.BlockSpec((3, WCin, WCout), lambda i: (0, 0, 0)),
            pl.BlockSpec((1, WCout), lambda i: (0, 0)),
            pl.BlockSpec((WCout, WCout), lambda i: (0, 0)),
            pl.BlockSpec((1, WCout), lambda i: (0, 0)),
            pl.BlockSpec((1, WCout), lambda i: (0, 0)),
            pl.BlockSpec((3, WCout, WCout), lambda i: (0, 0, 0)),
            pl.BlockSpec((1, WCout), lambda i: (0, 0)),
        ],
        out_specs=pl.BlockSpec((N, H, WCout), lambda i: (0, 0, 0)),
        scratch_shapes=[pltpu.VMEM((N, H + 2, WCin), f32),
                        pltpu.VMEM((N, H + 2, WCout), f32)],
        compiler_params=pltpu.CompilerParams(
            dimension_semantics=("arbitrary",),
            vmem_limit_bytes=vmem),
    )(x2, prep["w1b"], prep["b1r"], prep["sel"], prep["gr"], prep["btr"],
      prep["w2b"], prep["b2r"])

    y = y.reshape(N, H, W, Cout)
    return jnp.transpose(y, (0, 3, 1, 2))                 # NHWC -> NCHW


# ---------------------------------------------------------------------------
# Pure-JAX reference (same math) for validation
# ---------------------------------------------------------------------------
def reference_forward(x_nchw, params):
    x = jnp.transpose(x_nchw, (0, 2, 3, 1)).astype(jnp.float32)
    dn = ('NHWC', 'HWIO', 'NHWC')
    h = jax.lax.conv_general_dilated(x, params["w1"], (1, 1), 'SAME',
                                     dimension_numbers=dn)
    h = jnp.maximum(h + params["b1"].reshape(1, 1, 1, -1), 0.0)
    mean = jnp.mean(h, axis=(0, 1, 2), keepdims=True)
    var = jnp.mean((h - mean) ** 2, axis=(0, 1, 2), keepdims=True)
    h = (h - mean) / jnp.sqrt(var + EPS) * params["gamma"].reshape(1, 1, 1, -1) \
        + params["beta"].reshape(1, 1, 1, -1)
    h = jax.lax.conv_general_dilated(h, params["w2"], (1, 1), 'SAME',
                                     dimension_numbers=dn)
    h = jnp.maximum(h + params["b2"].reshape(1, 1, 1, -1), 0.0)
    return jnp.transpose(h, (0, 3, 1, 2))


def init_params(key, in_ch, out_ch):
    k1, k2, k3, k4, k5, k6 = jax.random.split(key, 6)
    return {
        # conv weights stored directly in HWIO layout
        "w1": 0.1 * jax.random.normal(k1, (3, 3, in_ch, out_ch), jnp.float32),
        "b1": 0.1 * jax.random.normal(k2, (out_ch,), jnp.float32),
        "gamma": 1.0 + 0.1 * jax.random.normal(k3, (out_ch,), jnp.float32),
        "beta": 0.1 * jax.random.normal(k4, (out_ch,), jnp.float32),
        "w2": 0.1 * jax.random.normal(k5, (3, 3, out_ch, out_ch), jnp.float32),
        "b2": 0.1 * jax.random.normal(k6, (out_ch,), jnp.float32),
    }


if __name__ == "__main__":
    key = jax.random.PRNGKey(0)
    kx, kp = jax.random.split(key)

    N, in_ch, out_ch, H, W = 2, 4, 8, 16, 16
    x = jax.random.normal(kx, (N, in_ch, H, W), jnp.float32)   # NCHW like PyTorch
    params = init_params(kp, in_ch, out_ch)

    ref = jax.block_until_ready(reference_forward(x, params))

    fwd = jax.jit(block_forward)

    # f32 MXU path (exact-ish) -- default.
    prep_f32 = prepare_block(params, W, compute_dtype=jnp.float32)
    out = jax.block_until_ready(fwd(x, prep_f32))
    assert out.shape == (N, out_ch, H, W)
    err = float(jnp.max(jnp.abs(out - ref)))
    assert jnp.allclose(out, ref, rtol=1e-4, atol=1e-4), f"f32 max abs diff = {err}"

    # bf16 MXU path (f32 accumulation) -- ~3x matmul throughput on v5e, native
    # on v6e/v7x; BN/ReLU/statistics math stays f32.  Mean/var are computed
    # from bf16-rounded conv1 activations (intentional; loose tolerance).
    prep_bf16 = prepare_block(params, W, compute_dtype=jnp.bfloat16)
    out_bf16 = jax.block_until_ready(fwd(x, prep_bf16))
    err_bf16 = float(jnp.max(jnp.abs(out_bf16 - ref)))
    assert jnp.allclose(out_bf16, ref, rtol=5e-2, atol=1e-1), \
        f"bf16 max abs diff = {err_bf16}"

    print("KERNEL_OK")
</pallas_src>

<mosaic_0001>
module attributes {stable_mosaic.version = 11 : i64} {
  func.func @fused_block_kernel(%arg0: i32, %arg1: memref<2x16x64xf32, #tpu.memory_space<vmem>>, %arg2: memref<3x64x128xf32, #tpu.memory_space<vmem>>, %arg3: memref<1x128xf32, #tpu.memory_space<vmem>>, %arg4: memref<128x128xf32, #tpu.memory_space<vmem>>, %arg5: memref<1x128xf32, #tpu.memory_space<vmem>>, %arg6: memref<1x128xf32, #tpu.memory_space<vmem>>, %arg7: memref<3x128x128xf32, #tpu.memory_space<vmem>>, %arg8: memref<1x128xf32, #tpu.memory_space<vmem>>, %arg9: memref<2x16x128xf32, #tpu.memory_space<vmem>>, %arg10: memref<2x18x64xf32, #tpu.memory_space<vmem>>, %arg11: memref<2x18x128xf32, #tpu.memory_space<vmem>>) attributes {dimension_semantics = [#tpu.dimension_semantics<arbitrary>], iteration_bounds = array<i64: 1>, scalar_prefetch = 0 : i64, scratch_operands = 2 : i64, tpu.core_type = #tpu.core_type<tc>, window_params = [{pipeline_mode = #tpu.pipeline_mode<synchronous>, transform_indices = @transform_0, window_bounds = array<i64: 2, 16, 64>}, {pipeline_mode = #tpu.pipeline_mode<synchronous>, transform_indices = @transform_1, window_bounds = array<i64: 3, 64, 128>}, {pipeline_mode = #tpu.pipeline_mode<synchronous>, transform_indices = @transform_2, window_bounds = array<i64: 1, 128>}, {pipeline_mode = #tpu.pipeline_mode<synchronous>, transform_indices = @transform_3, window_bounds = array<i64: 128, 128>}, {pipeline_mode = #tpu.pipeline_mode<synchronous>, transform_indices = @transform_4, window_bounds = array<i64: 1, 128>}, {pipeline_mode = #tpu.pipeline_mode<synchronous>, transform_indices = @transform_5, window_bounds = array<i64: 1, 128>}, {pipeline_mode = #tpu.pipeline_mode<synchronous>, transform_indices = @transform_6, window_bounds = array<i64: 3, 128, 128>}, {pipeline_mode = #tpu.pipeline_mode<synchronous>, transform_indices = @transform_7, window_bounds = array<i64: 1, 128>}, {pipeline_mode = #tpu.pipeline_mode<synchronous>, transform_indices = @transform_8, window_bounds = array<i64: 2, 16, 128>}]} {
    %cst = arith.constant 0.000000e+00 : f32
    %0 = vector.broadcast %cst : f32 to vector<2x1x64xf32>
    %c0 = arith.constant 0 : index
    %c0_0 = arith.constant 0 : index
    %c0_1 = arith.constant 0 : index
    %1 = vector.load %arg10[%c0, %c0_0, %c0_1] : memref<2x18x64xf32, #tpu.memory_space<vmem>>, vector<2x1x64xf32>
    tpu.vector_store %arg10[%c0, %c0_0, %c0_1], %0 {strides = array<i32>} : memref<2x18x64xf32, #tpu.memory_space<vmem>>, vector<2x1x64xf32>,
    %cst_2 = arith.constant 0.000000e+00 : f32
    %2 = vector.broadcast %cst_2 : f32 to vector<2x1x64xf32>
    %c0_3 = arith.constant 0 : index
    %c17 = arith.constant 17 : index
    %c0_4 = arith.constant 0 : index
    %3 = vector.load %arg10[%c0_3, %c17, %c0_4] : memref<2x18x64xf32, #tpu.memory_space<vmem>>, vector<2x1x64xf32>
    tpu.vector_store %arg10[%c0_3, %c17, %c0_4], %2 {strides = array<i32>} : memref<2x18x64xf32, #tpu.memory_space<vmem>>, vector<2x1x64xf32>,
    %c0_5 = arith.constant 0 : index
    %c0_6 = arith.constant 0 : index
    %c0_7 = arith.constant 0 : index
    %4 = vector.load %arg1[%c0_5, %c0_6, %c0_7] : memref<2x16x64xf32, #tpu.memory_space<vmem>>, vector<2x16x64xf32>
    %c0_8 = arith.constant 0 : index
    %c1 = arith.constant 1 : index
    %c0_9 = arith.constant 0 : index
    %5 = vector.load %arg10[%c0_8, %c1, %c0_9] : memref<2x18x64xf32, #tpu.memory_space<vmem>>, vector<2x16x64xf32>
    tpu.vector_store %arg10[%c0_8, %c1, %c0_9], %4 {strides = array<i32>} : memref<2x18x64xf32, #tpu.memory_space<vmem>>, vector<2x16x64xf32>,
    %c0_10 = arith.constant 0 : index
    %c0_11 = arith.constant 0 : index
    %c0_12 = arith.constant 0 : index
    %6 = vector.load %arg10[%c0_10, %c0_11, %c0_12] : memref<2x18x64xf32, #tpu.memory_space<vmem>>, vector<2x16x64xf32>
    %7 = vector.shape_cast %6 : vector<2x16x64xf32> to vector<32x64xf32>
    %c0_13 = arith.constant 0 : index
    %c0_14 = arith.constant 0 : index
    %c0_15 = arith.constant 0 : index
    %8 = vector.load %arg2[%c0_13, %c0_14, %c0_15] : memref<3x64x128xf32, #tpu.memory_space<vmem>>, vector<1x64x128xf32>
    %9 = vector.shape_cast %8 : vector<1x64x128xf32> to vector<64x128xf32>
    %cst_16 = arith.constant dense<0.000000e+00> : vector<32x128xf32>
    %10 = tpu.matmul %7, %9, %cst_16 {dimension_numbers = #tpu.dot_dimension_numbers<[1], [0], [0], [1], [0, 0, 1, 1], [], []>} : vector<32x64xf32>, vector<64x128xf32>, vector<32x128xf32> -> vector<32x128xf32>
    %c0_17 = arith.constant 0 : index
    %c1_18 = arith.constant 1 : index
    %c0_19 = arith.constant 0 : index
    %11 = vector.load %arg10[%c0_17, %c1_18, %c0_19] : memref<2x18x64xf32, #tpu.memory_space<vmem>>, vector<2x16x64xf32>
    %12 = vector.shape_cast %11 : vector<2x16x64xf32> to vector<32x64xf32>
    %c1_20 = arith.constant 1 : index
    %c0_21 = arith.constant 0 : index
    %c0_22 = arith.constant 0 : index
    %13 = vector.load %arg2[%c1_20, %c0_21, %c0_22] : memref<3x64x128xf32, #tpu.memory_space<vmem>>, vector<1x64x128xf32>
    %14 = vector.shape_cast %13 : vector<1x64x128xf32> to vector<64x128xf32>
    %cst_23 = arith.constant dense<0.000000e+00> : vector<32x128xf32>
    %15 = tpu.matmul %12, %14, %cst_23 {dimension_numbers = #tpu.dot_dimension_numbers<[1], [0], [0], [1], [0, 0, 1, 1], [], []>} : vector<32x64xf32>, vector<64x128xf32>, vector<32x128xf32> -> vector<32x128xf32>
    %16 = arith.addf %10, %15 : vector<32x128xf32>
    %c0_24 = arith.constant 0 : index
    %c2 = arith.constant 2 : index
    %c0_25 = arith.constant 0 : index
    %17 = vector.load %arg10[%c0_24, %c2, %c0_25] : memref<2x18x64xf32, #tpu.memory_space<vmem>>, vector<2x16x64xf32>
    %18 = vector.shape_cast %17 : vector<2x16x64xf32> to vector<32x64xf32>
    %c2_26 = arith.constant 2 : index
    %c0_27 = arith.constant 0 : index
    %c0_28 = arith.constant 0 : index
    %19 = vector.load %arg2[%c2_26, %c0_27, %c0_28] : memref<3x64x128xf32, #tpu.memory_space<vmem>>, vector<1x64x128xf32>
    %20 = vector.shape_cast %19 : vector<1x64x128xf32> to vector<64x128xf32>
    %cst_29 = arith.constant dense<0.000000e+00> : vector<32x128xf32>
    %21 = tpu.matmul %18, %20, %cst_29 {dimension_numbers = #tpu.dot_dimension_numbers<[1], [0], [0], [1], [0, 0, 1, 1], [], []>} : vector<32x64xf32>, vector<64x128xf32>, vector<32x128xf32> -> vector<32x128xf32>
    %22 = arith.addf %16, %21 : vector<32x128xf32>
    %c0_30 = arith.constant 0 : index
    %c0_31 = arith.constant 0 : index
    %23 = vector.load %arg3[%c0_30, %c0_31] : memref<1x128xf32, #tpu.memory_space<vmem>>, vector<1x128xf32>
    %24 = vector.broadcast %23 : vector<1x128xf32> to vector<32x128xf32>
    %25 = arith.addf %22, %24 : vector<32x128xf32>
    %cst_32 = arith.constant 0.000000e+00 : f32
    %26 = vector.broadcast %cst_32 : f32 to vector<32x128xf32>
    %27 = arith.maximumf %25, %26 : vector<32x128xf32>
    %cst_33 = arith.constant dense<0.000000e+00> : vector<128xf32>
    %28 = vector.multi_reduction <add>, %27, %cst_33 [0] : vector<32x128xf32> to vector<128xf32>
    %29 = vector.shape_cast %28 : vector<128xf32> to vector<1x128xf32>
    %c0_34 = arith.constant 0 : index
    %c0_35 = arith.constant 0 : index
    %30 = vector.load %arg4[%c0_34, %c0_35] : memref<128x128xf32, #tpu.memory_space<vmem>>, vector<128x128xf32>
    %cst_36 = arith.constant dense<0.000000e+00> : vector<1x128xf32>
    %31 = tpu.matmul %29, %30, %cst_36 {dimension_numbers = #tpu.dot_dimension_numbers<[1], [0], [0], [1], [0, 0, 1, 1], [], []>} : vector<1x128xf32>, vector<128x128xf32>, vector<1x128xf32> -> vector<1x128xf32>
    %32 = arith.mulf %27, %27 : vector<32x128xf32>
    %cst_37 = arith.constant dense<0.000000e+00> : vector<128xf32>
    %33 = vector.multi_reduction <add>, %32, %cst_37 [0] : vector<32x128xf32> to vector<128xf32>
    %34 = vector.shape_cast %33 : vector<128xf32> to vector<1x128xf32>
    %c0_38 = arith.constant 0 : index
    %c0_39 = arith.constant 0 : index
    %35 = vector.load %arg4[%c0_38, %c0_39] : memref<128x128xf32, #tpu.memory_space<vmem>>, vector<128x128xf32>
    %cst_40 = arith.constant dense<0.000000e+00> : vector<1x128xf32>
    %36 = tpu.matmul %34, %35, %cst_40 {dimension_numbers = #tpu.dot_dimension_numbers<[1], [0], [0], [1], [0, 0, 1, 1], [], []>} : vector<1x128xf32>, vector<128x128xf32>, vector<1x128xf32> -> vector<1x128xf32>
    %cst_41 = arith.constant 0.001953125 : f32
    %37 = vector.broadcast %cst_41 : f32 to vector<1x128xf32>
    %38 = arith.mulf %31, %37 : vector<1x128xf32>
    %cst_42 = arith.constant 0.001953125 : f32
    %39 = vector.broadcast %cst_42 : f32 to vector<1x128xf32>
    %40 = arith.mulf %36, %39 : vector<1x128xf32>
    %41 = arith.mulf %38, %38 : vector<1x128xf32>
    %42 = arith.subf %40, %41 : vector<1x128xf32>
    %cst_43 = arith.constant 0.000000e+00 : f32
    %43 = vector.broadcast %cst_43 : f32 to vector<1x128xf32>
    %44 = arith.maximumf %42, %43 : vector<1x128xf32>
    %c0_44 = arith.constant 0 : index
    %c0_45 = arith.constant 0 : index
    %45 = vector.load %arg5[%c0_44, %c0_45] : memref<1x128xf32, #tpu.memory_space<vmem>>, vector<1x128xf32>
    %cst_46 = arith.constant 9.99999974E-6 : f32
    %46 = vector.broadcast %cst_46 : f32 to vector<1x128xf32>
    %47 = arith.addf %44, %46 : vector<1x128xf32>
    %48 = math.rsqrt %47 : vector<1x128xf32>
    %49 = arith.mulf %45, %48 : vector<1x128xf32>
    %c0_47 = arith.constant 0 : index
    %c0_48 = arith.constant 0 : index
    %50 = vector.load %arg6[%c0_47, %c0_48] : memref<1x128xf32, #tpu.memory_space<vmem>>, vector<1x128xf32>
    %51 = arith.mulf %38, %49 : vector<1x128xf32>
    %52 = arith.subf %50, %51 : vector<1x128xf32>
    %cst_49 = arith.constant 0.000000e+00 : f32
    %53 = vector.broadcast %cst_49 : f32 to vector<2x1x128xf32>
    %c0_50 = arith.constant 0 : index
    %c0_51 = arith.constant 0 : index
    %c0_52 = arith.constant 0 : index
    %54 = vector.load %arg11[%c0_50, %c0_51, %c0_52] : memref<2x18x128xf32, #tpu.memory_space<vmem>>, vector<2x1x128xf32>
    tpu.vector_store %arg11[%c0_50, %c0_51, %c0_52], %53 {strides = array<i32>} : memref<2x18x128xf32, #tpu.memory_space<vmem>>, vector<2x1x128xf32>,
    %cst_53 = arith.constant 0.000000e+00 : f32
    %55 = vector.broadcast %cst_53 : f32 to vector<2x1x128xf32>
    %c0_54 = arith.constant 0 : index
    %c17_55 = arith.constant 17 : index
    %c0_56 = arith.constant 0 : index
    %56 = vector.load %arg11[%c0_54, %c17_55, %c0_56] : memref<2x18x128xf32, #tpu.memory_space<vmem>>, vector<2x1x128xf32>
    tpu.vector_store %arg11[%c0_54, %c17_55, %c0_56], %55 {strides = array<i32>} : memref<2x18x128xf32, #tpu.memory_space<vmem>>, vector<2x1x128xf32>,
    %57 = vector.broadcast %49 : vector<1x128xf32> to vector<32x128xf32>
    %58 = arith.mulf %27, %57 : vector<32x128xf32>
    %59 = vector.broadcast %52 : vector<1x128xf32> to vector<32x128xf32>
    %60 = arith.addf %58, %59 : vector<32x128xf32>
    %61 = vector.shape_cast %60 : vector<32x128xf32> to vector<2x16x128xf32>
    %c0_57 = arith.constant 0 : index
    %c1_58 = arith.constant 1 : index
    %c0_59 = arith.constant 0 : index
    %62 = vector.load %arg11[%c0_57, %c1_58, %c0_59] : memref<2x18x128xf32, #tpu.memory_space<vmem>>, vector<2x16x128xf32>
    tpu.vector_store %arg11[%c0_57, %c1_58, %c0_59], %61 {strides = array<i32>} : memref<2x18x128xf32, #tpu.memory_space<vmem>>, vector<2x16x128xf32>,
    %c0_60 = arith.constant 0 : index
    %c0_61 = arith.constant 0 : index
    %c0_62 = arith.constant 0 : index
    %63 = vector.load %arg11[%c0_60, %c0_61, %c0_62] : memref<2x18x128xf32, #tpu.memory_space<vmem>>, vector<2x16x128xf32>
    %64 = vector.shape_cast %63 : vector<2x16x128xf32> to vector<32x128xf32>
    %c0_63 = arith.constant 0 : index
    %c0_64 = arith.constant 0 : index
    %c0_65 = arith.constant 0 : index
    %65 = vector.load %arg7[%c0_63, %c0_64, %c0_65] : memref<3x128x128xf32, #tpu.memory_space<vmem>>, vector<1x128x128xf32>
    %66 = vector.shape_cast %65 : vector<1x128x128xf32> to vector<128x128xf32>
    %cst_66 = arith.constant dense<0.000000e+00> : vector<32x128xf32>
    %67 = tpu.matmul %64, %66, %cst_66 {dimension_numbers = #tpu.dot_dimension_numbers<[1], [0], [0], [1], [0, 0, 1, 1], [], []>} : vector<32x128xf32>, vector<128x128xf32>, vector<32x128xf32> -> vector<32x128xf32>
    %c0_67 = arith.constant 0 : index
    %c1_68 = arith.constant 1 : index
    %c0_69 = arith.constant 0 : index
    %68 = vector.load %arg11[%c0_67, %c1_68, %c0_69] : memref<2x18x128xf32, #tpu.memory_space<vmem>>, vector<2x16x128xf32>
    %69 = vector.shape_cast %68 : vector<2x16x128xf32> to vector<32x128xf32>
    %c1_70 = arith.constant 1 : index
    %c0_71 = arith.constant 0 : index
    %c0_72 = arith.constant 0 : index
    %70 = vector.load %arg7[%c1_70, %c0_71, %c0_72] : memref<3x128x128xf32, #tpu.memory_space<vmem>>, vector<1x128x128xf32>
    %71 = vector.shape_cast %70 : vector<1x128x128xf32> to vector<128x128xf32>
    %cst_73 = arith.constant dense<0.000000e+00> : vector<32x128xf32>
    %72 = tpu.matmul %69, %71, %cst_73 {dimension_numbers = #tpu.dot_dimension_numbers<[1], [0], [0], [1], [0, 0, 1, 1], [], []>} : vector<32x128xf32>, vector<128x128xf32>, vector<32x128xf32> -> vector<32x128xf32>
    %73 = arith.addf %67, %72 : vector<32x128xf32>
    %c0_74 = arith.constant 0 : index
    %c2_75 = arith.constant 2 : index
    %c0_76 = arith.constant 0 : index
    %74 = vector.load %arg11[%c0_74, %c2_75, %c0_76] : memref<2x18x128xf32, #tpu.memory_space<vmem>>, vector<2x16x128xf32>
    %75 = vector.shape_cast %74 : vector<2x16x128xf32> to vector<32x128xf32>
    %c2_77 = arith.constant 2 : index
    %c0_78 = arith.constant 0 : index
    %c0_79 = arith.constant 0 : index
    %76 = vector.load %arg7[%c2_77, %c0_78, %c0_79] : memref<3x128x128xf32, #tpu.memory_space<vmem>>, vector<1x128x128xf32>
    %77 = vector.shape_cast %76 : vector<1x128x128xf32> to vector<128x128xf32>
    %cst_80 = arith.constant dense<0.000000e+00> : vector<32x128xf32>
    %78 = tpu.matmul %75, %77, %cst_80 {dimension_numbers = #tpu.dot_dimension_numbers<[1], [0], [0], [1], [0, 0, 1, 1], [], []>} : vector<32x128xf32>, vector<128x128xf32>, vector<32x128xf32> -> vector<32x128xf32>
    %79 = arith.addf %73, %78 : vector<32x128xf32>
    %c0_81 = arith.constant 0 : index
    %c0_82 = arith.constant 0 : index
    %80 = vector.load %arg8[%c0_81, %c0_82] : memref<1x128xf32, #tpu.memory_space<vmem>>, vector<1x128xf32>
    %81 = vector.broadcast %80 : vector<1x128xf32> to vector<32x128xf32>
    %82 = arith.addf %79, %81 : vector<32x128xf32>
    %cst_83 = arith.constant 0.000000e+00 : f32
    %83 = vector.broadcast %cst_83 : f32 to vector<32x128xf32>
    %84 = arith.maximumf %82, %83 : vector<32x128xf32>
    %85 = vector.shape_cast %84 : vector<32x128xf32> to vector<2x16x128xf32>
    %c0_84 = arith.constant 0 : index
    %c0_85 = arith.constant 0 : index
    %c0_86 = arith.constant 0 : index
    %86 = vector.load %arg9[%c0_84, %c0_85, %c0_86] : memref<2x16x128xf32, #tpu.memory_space<vmem>>, vector<2x16x128xf32>
    tpu.vector_store %arg9[%c0_84, %c0_85, %c0_86], %85 {strides = array<i32>} : memref<2x16x128xf32, #tpu.memory_space<vmem>>, vector<2x16x128xf32>,
    return
  }
  func.func @transform_0(%arg0: i32) -> (i32, i32, i32) {
    %c0_i32 = arith.constant 0 : i32
    %c0_i32_0 = arith.constant 0 : i32
    %c0_i32_1 = arith.constant 0 : i32
    %c0_i32_2 = arith.constant 0 : i32
    return %c0_i32, %c0_i32_0, %c0_i32_1 : i32, i32, i32
  }
  func.func @transform_1(%arg0: i32) -> (i32, i32, i32) {
    %c0_i32 = arith.constant 0 : i32
    %c0_i32_0 = arith.constant 0 : i32
    %c0_i32_1 = arith.constant 0 : i32
    %c0_i32_2 = arith.constant 0 : i32
    return %c0_i32, %c0_i32_0, %c0_i32_1 : i32, i32, i32
  }
  func.func @transform_2(%arg0: i32) -> (i32, i32) {
    %c0_i32 = arith.constant 0 : i32
    %c0_i32_0 = arith.constant 0 : i32
    %c0_i32_1 = arith.constant 0 : i32
    return %c0_i32, %c0_i32_0 : i32, i32
  }
  func.func @transform_3(%arg0: i32) -> (i32, i32) {
    %c0_i32 = arith.constant 0 : i32
    %c0_i32_0 = arith.constant 0 : i32
    %c0_i32_1 = arith.constant 0 : i32
    return %c0_i32, %c0_i32_0 : i32, i32
  }
  func.func @transform_4(%arg0: i32) -> (i32, i32) {
    %c0_i32 = arith.constant 0 : i32
    %c0_i32_0 = arith.constant 0 : i32
    %c0_i32_1 = arith.constant 0 : i32
    return %c0_i32, %c0_i32_0 : i32, i32
  }
  func.func @transform_5(%arg0: i32) -> (i32, i32) {
    %c0_i32 = arith.constant 0 : i32
    %c0_i32_0 = arith.constant 0 : i32
    %c0_i32_1 = arith.constant 0 : i32
    return %c0_i32, %c0_i32_0 : i32, i32
  }
  func.func @transform_6(%arg0: i32) -> (i32, i32, i32) {
    %c0_i32 = arith.constant 0 : i32
    %c0_i32_0 = arith.constant 0 : i32
    %c0_i32_1 = arith.constant 0 : i32
    %c0_i32_2 = arith.constant 0 : i32
    return %c0_i32, %c0_i32_0, %c0_i32_1 : i32, i32, i32
  }
  func.func @transform_7(%arg0: i32) -> (i32, i32) {
    %c0_i32 = arith.constant 0 : i32
    %c0_i32_0 = arith.constant 0 : i32
    %c0_i32_1 = arith.constant 0 : i32
    return %c0_i32, %c0_i32_0 : i32, i32
  }
  func.func @transform_8(%arg0: i32) -> (i32, i32, i32) {
    %c0_i32 = arith.constant 0 : i32
    %c0_i32_0 = arith.constant 0 : i32
    %c0_i32_1 = arith.constant 0 : i32
    %c0_i32_2 = arith.constant 0 : i32
    return %c0_i32, %c0_i32_0, %c0_i32_1 : i32, i32, i32
  }
}

</mosaic_0001>

<bundles_post_ra>
// kernel: block_forward.1
= control target key start
LH: loop header
LB: loop body
LE: loop exit
PB: predicated region body
PF: predicated region fallthrough
CT: control target
= control target key end

     0   :  { %13 = vsyncpa [#allocation5], 0  ;;  %s938_s0 = inlined_call_operand.vmem [shape: f32[2,16,64], index: 0, kind: input, shape index: {}]   ;;  %s939_s1 = inlined_call_operand.hbm [shape: f32[3,64,128], index: 1, kind: input, shape index: {}]   ;;  %s940_s2 = inlined_call_operand.vmem [shape: f32[1,128], index: 2, kind: input, shape index: {}]   ;;  %s941_s3 = inlined_call_operand.hbm [shape: f32[128,128], index: 3, kind: input, shape index: {}]   ;;  %s942_s4 = inlined_call_operand.vmem [shape: f32[1,128], index: 4, kind: input, shape index: {}]   ;;  %s943_s5 = inlined_call_operand.vmem [shape: f32[1,128], index: 5, kind: input, shape index: {}]   ;;  %s944_s6 = inlined_call_operand.vmem [shape: f32[3,128,128], index: 6, kind: input, shape index: {}]   ;;  %s945_s7 = inlined_call_operand.vmem [shape: f32[1,128], index: 7, kind: input, shape index: {}]   ;;  %s946_s8 = inlined_call_operand.vmem [shape: f32[2,16,128], index: 8, kind: output, shape index: {}]  }
   0x1   :  { %s21_s29 = sshll.u32 %s939_s1, 4  ;;  %s22_s29 = int_to_ptr.hbm [resolvable:$true] %s21_s29 }
   0x2   :  { %14 = vsyncpa [#allocation7], 0  ;;  %s653_s30 = smov [#allocation4]   ;;  %s36_s12 = sshll.u32 %s941_s3, 4  ;;  %s37_s12 = int_to_ptr.hbm [resolvable:$true] %s36_s12 }
   0x3   :  { %s23_s9 = sshll.u32 %s653_s30, 4  ;;  %s654_s13 = smov 128   ;;  %s24_s9 = int_to_ptr.vmem [resolvable:$true] %s23_s9 }
   0x4   :  { %s655_s14 = smov 8   ;;  %s656_s15 = smov [#allocation6]  }
   0x5   :  { %29 = dma.hbm_to_vmem [thread:$0]  %s22_s29, 3072, %s24_s9, [#allocation5], %s654_s13, %s654_s13, %s655_s14  }
   0x6   :  { %s38_s16 = sshll.u32 %s656_s15, 4  ;;  %s39_s16 = int_to_ptr.vmem [resolvable:$true] %s38_s16 }
   0x7   :  { %44 = dma.hbm_to_vmem [thread:$0]  %s37_s12, 2048, %s39_s16, [#allocation7], %s654_s13, %s654_s13, %s655_s14  }
   0x8   :  { %649 = dma.done.wait [#allocation5], 3072  }
   0x9   :  { %650 = vsyncadd [#allocation5], 4294964224 }
   0xa   :  { %651 = dma.done.wait [#allocation7], 2048  }
   0xb   :  { %652 = vsyncadd [#allocation7], 4294965248  ;;  %vm61_vm0 = vcmask 516096   ;;  %v657_v0 = vmov 0.0   ;;  %v99_v1 = vld [vmem:[#allocation4 + $0x78] sm:$0xff]  ;;  %v98_v2 = vld [vmem:[#allocation4 + $0x70] sm:$0xff] }
   0xc   :  { %62 = vst.msk [vmem:[#allocation2] sm:$0x1] %vm61_vm0, %v657_v0  ;;  %v194_v3 = vld [vmem:[#allocation4 + $0xb8] sm:$0xff]  ;;  %120 = vmatpush.msra.mxu3 %v99_v1  ;;  %v193_v4 = vld [vmem:[#allocation4 + $0xb0] sm:$0xff]  ;;  %v97_v5 = vld [vmem:[#allocation4 + $0x68] sm:$0xff]  ;;  %vm70_vm1 = vcmask 523264  }
   0xd   :  { %63 = vst.msk [vmem:[#allocation2 + $0x18] sm:$0x1] %vm61_vm0, %v657_v0  ;;  %215 = vmatpush.msra.mxu2 %v194_v3  ;;  %v86_v6 = vld [vmem:[#allocation4 + $0x38] sm:$0xff]  ;;  %v192_v7 = vld [vmem:[#allocation4 + $0xa8] sm:$0xff]  ;;  %v85_v8 = vld [vmem:[#allocation4 + $0x30] sm:$0xff] }
   0xe   :  { %64 = vst.msk [vmem:[#allocation2 + $0x11] sm:$0x1] %vm61_vm0, %v657_v0  ;;  %121 = vmatpush.msra.mxu3 %v98_v2  ;;  %v96_v9 = vld [vmem:[#allocation4 + $0x60] sm:$0xff]  ;;  %161 = vmatpush.msra.mxu1 %v86_v6  ;;  %v84_v11 = vld [vmem:[#allocation4 + $0x28] sm:$0xff]  ;;  %v95_v12 = vld [vmem:[#allocation4 + $0x58] sm:$0xff] }
   0xf   :  { %65 = vst.msk [vmem:[#allocation2 + $0x29] sm:$0x1] %vm61_vm0, %v657_v0  ;;  %216 = vmatpush.msra.mxu2 %v193_v4  ;;  %v191_v10 = vld [vmem:[#allocation4 + $0xa0] sm:$0xff]  ;;  %v190_v13 = vld [vmem:[#allocation4 + $0x98] sm:$0xff]  ;;  %v94_v15 = vld [vmem:[#allocation4 + $0x50] sm:$0xff] }
  0x10   :  { %351 = vst [vmem:[#allocation3] sm:$0x1] %v657_v0  ;;  %122 = vmatpush.msra.mxu3 %v97_v5  ;;  %162 = vmatpush.msra.mxu1 %v85_v8  ;;  %v66_v14 = vld [vmem:[%s938_s0] sm:$0xff]  ;;  %v67_v17 = vld [vmem:[%s938_s0 + $0x8] sm:$0xff]  ;;  %v189_v18 = vld [vmem:[#allocation4 + $0x90] sm:$0xff] }
  0x11   :  { %352 = vst [vmem:[#allocation3 + $0x18] sm:$0x1] %v657_v0  ;;  %217 = vmatpush.msra.mxu2 %v192_v7  ;;  %v83_v16 = vld [vmem:[#allocation4 + $0x20] sm:$0xff]  ;;  %v82_v19 = vld [vmem:[#allocation4 + $0x18] sm:$0xff]  ;;  %v68_v20 = vld [vmem:[%s938_s0 + $0x10] sm:$0xff] }
  0x12   :  { %353 = vst [vmem:[#allocation3 + $0x11] sm:$0x1] %v657_v0  ;;  %123 = vmatpush.msra.mxu3 %v96_v9  ;;  %163 = vmatpush.msra.mxu1 %v84_v11  ;;  %v69_v21 = vld [vmem:[%s938_s0 + $0x18] sm:$0xff]  ;;  %v93_v22 = vld [vmem:[#allocation4 + $0x48] sm:$0xff]  ;;  %v81_v24 = vld [vmem:[#allocation4 + $0x10] sm:$0xff] }
  0x13   :  { %354 = vst [vmem:[#allocation3 + $0x29] sm:$0x1] %v657_v0  ;;  %218 = vmatpush.msra.mxu2 %v191_v10  ;;  %v188_v23 = vld [vmem:[#allocation4 + $0x88] sm:$0xff]  ;;  %v92_v25 = vld [vmem:[#allocation4 + $0x40] sm:$0xff]  ;;  %v725_v27 = vld [vmem:[#allocation6 + $0x78] sm:$0xff] }
  0x14   :  { %71 = vst.msk [vmem:[#allocation2 + $0x1] sm:$0xff] %vm70_vm1, %v66_v14  ;;  %124 = vmatpush.msra.mxu3 %v95_v12  ;;  %164 = vmatpush.msra.mxu1 %v83_v16  ;;  %v187_v26 = vld [vmem:[#allocation4 + $0x80] sm:$0xff]  ;;  %v80_v29 = vld [vmem:[#allocation4 + $0x8] sm:$0xff]  ;;  %v275_v30 = vld [vmem:[#allocation6 + $0x70] sm:$0xff] }
  0x15   :  { %72 = vst.msk [vmem:[#allocation2 + $0x9] sm:$0xff] %vm70_vm1, %v67_v17  ;;  %219 = vmatpush.msra.mxu2 %v190_v13  ;;  %277 = vmatpush.msra.mxu0 %v725_v27  ;;  %v79_v32 = vld [vmem:[#allocation4] sm:$0xff]  ;;  %v274_v33 = vld [vmem:[#allocation6 + $0x68] sm:$0xff]  ;;  %v272_v45 = vld [vmem:[#allocation6 + $0x58] sm:$0xff] }
  0x16   :  { %73 = vst.msk [vmem:[#allocation2 + $0x19] sm:$0xff] %vm70_vm1, %v68_v20  ;;  %125 = vmatpush.msra.mxu3 %v94_v15  ;;  %165 = vmatpush.msra.mxu1 %v82_v19  ;;  %v273_v35 = vld [vmem:[#allocation6 + $0x60] sm:$0xff]  ;;  %v271_v46 = vld [vmem:[#allocation6 + $0x50] sm:$0xff]  ;;  %v270_v47 = vld [vmem:[#allocation6 + $0x48] sm:$0xff] }
  0x17   :  { %74 = vst.msk [vmem:[#allocation2 + $0x21] sm:$0xff] %vm70_vm1, %v69_v21  ;;  %220 = vmatpush.msra.mxu2 %v189_v18  ;;  %278 = vmatpush.msra.mxu0 %v275_v30  ;;  %v269_v48 = vld [vmem:[#allocation6 + $0x40] sm:$0xff]  ;;  %v268_v49 = vld [vmem:[#allocation6 + $0x38] sm:$0xff]  ;;  %v267_v50 = vld [vmem:[#allocation6 + $0x30] sm:$0xff] }
  0x18   :  { %126 = vmatpush.msra.mxu3 %v93_v22  ;;  %166 = vmatpush.msra.mxu1 %v81_v24  ;;  %v266_v51 = vld [vmem:[#allocation6 + $0x28] sm:$0xff]  ;;  %v265_v52 = vld [vmem:[#allocation6 + $0x20] sm:$0xff]  ;;  %v264_v53 = vld [vmem:[#allocation6 + $0x18] sm:$0xff] }
  0x19   :  { %221 = vmatpush.msra.mxu2 %v188_v23  ;;  %279 = vmatpush.msra.mxu0 %v274_v33  ;;  %v263_v54 = vld [vmem:[#allocation6 + $0x10] sm:$0xff]  ;;  %v262_v55 = vld [vmem:[#allocation6 + $0x8] sm:$0xff]  ;;  %v261_v56 = vld [vmem:[#allocation6] sm:$0xff] }
  0x1a   :  { %127 = vmatpush.msra.mxu3 %v92_v25  ;;  %167 = vmatpush.msra.mxu1 %v80_v29  ;;  %v597_v6 = vld [vmem:[%s940_s2] ss:$0 sm:$0xff] }
  0x1b   :  { %v87_v28 = vld [vmem:[#allocation2 + $0x1] sm:$0xff]  ;;  %222 = vmatpush.msra.mxu2 %v187_v26  ;;  %280 = vmatpush.msra.mxu0 %v273_v35 }
  0x1c   :  { %v182_v31 = vld [vmem:[#allocation2 + $0x2] sm:$0xff]  ;;  %548 = vmatmul.msk.f32.vlgmr.msra.gmra.mxu3 %vm70_vm1, %v87_v28  ;;  %168 = vmatpush.msra.mxu1 %v79_v32  ;;  %v183_v37 = vld [vmem:[#allocation2 + $0xa] sm:$0xff] }
  0x1d   :  { %556 = vmatmul.msk.f32.vlgmr.msra.gmra.mxu2 %vm70_vm1, %v182_v31  ;;  %v75_v34 = vld [vmem:[#allocation2] sm:$0xff]  ;;  %v88_v36 = vld [vmem:[#allocation2 + $0x9] sm:$0xff]  ;;  %v77_v41 = vld [vmem:[#allocation2 + $0x18] sm:$0xff]  ;;  %281 = vmatpush.msra.mxu0 %v272_v45 }
  0x1e   :  { %552 = vmatmul.msk.f32.vlgmr.msra.gmra.mxu1 %vm70_vm1, %v75_v34  ;;  %v76_v38 = vld [vmem:[#allocation2 + $0x8] sm:$0xff]  ;;  %v89_v39 = vld [vmem:[#allocation2 + $0x19] sm:$0xff] }
  0x1f   :  { %v184_v40 = vld [vmem:[#allocation2 + $0x1a] sm:$0xff]  ;;  %v185_v43 = vld [vmem:[#allocation2 + $0x22] sm:$0xff]  ;;  %282 = vmatpush.msra.mxu0 %v271_v46 }
  0x20   :  { %v90_v42 = vld [vmem:[#allocation2 + $0x21] sm:$0xff] }
  0x21   :  { %v78_v44 = vld [vmem:[#allocation2 + $0x20] sm:$0xff]  ;;  %283 = vmatpush.msra.mxu0 %v270_v47 }
  0x23   :  { %284 = vmatpush.msra.mxu0 %v269_v48 }
  0x24   :  { %549 = vmatmul.msk.f32.gmra.mxu3 %vm70_vm1, %v88_v36 }
  0x25   :  { %557 = vmatmul.msk.f32.gmra.mxu2 %vm70_vm1, %v183_v37  ;;  %285 = vmatpush.msra.mxu0 %v268_v49 }
  0x26   :  { %553 = vmatmul.msk.f32.gmra.mxu1 %vm70_vm1, %v76_v38 }
  0x27   :  { %286 = vmatpush.msra.mxu0 %v267_v50 }
  0x29   :  { %287 = vmatpush.msra.mxu0 %v266_v51 }
  0x2b   :  { %288 = vmatpush.msra.mxu0 %v265_v52 }
  0x2c   :  { %550 = vmatmul.msk.f32.gmra.mxu3 %vm70_vm1, %v89_v39 }
  0x2d   :  { %558 = vmatmul.msk.f32.gmra.mxu2 %vm70_vm1, %v184_v40  ;;  %289 = vmatpush.msra.mxu0 %v264_v53 }
  0x2e   :  { %554 = vmatmul.msk.f32.gmra.mxu1 %vm70_vm1, %v77_v41 }
  0x2f   :  { %290 = vmatpush.msra.mxu0 %v263_v54 }
  0x31   :  { %291 = vmatpush.msra.mxu0 %v262_v55 }
  0x33   :  { %292 = vmatpush.msra.mxu0 %v261_v56 }
  0x34   :  { %551 = vmatmul.msk.f32.gmra.mxu3 %vm70_vm1, %v90_v42 }
  0x35   :  { %559 = vmatmul.msk.f32.gmra.mxu2 %vm70_vm1, %v185_v43  ;;  %310 = vmatpush.msrb.mxu0 %v725_v27 }
  0x36   :  { %555 = vmatmul.msk.f32.gmra.mxu1 %vm70_vm1, %v78_v44  ;;  %v575_v44 = vld [vmem:[%s944_s6 + $0xf8] sm:$0xff] }
  0x37   :  { %311 = vmatpush.msrb.mxu0 %v275_v30  ;;  %414 = vmatpush.msrb.mxu1 %v575_v44 }
  0x39   :  { %312 = vmatpush.msrb.mxu0 %v274_v33 }
  0x3b   :  { %313 = vmatpush.msrb.mxu0 %v273_v35 }
  0x3d   :  { %314 = vmatpush.msrb.mxu0 %v272_v45  ;;  %v574_v45 = vld [vmem:[%s944_s6 + $0xf0] sm:$0xff] }
  0x3e   :  { %415 = vmatpush.msrb.mxu1 %v574_v45  ;;  %v335_v45 = vld [vmem:[%s942_s4] sm:$0x1] }
  0x3f   :  { %315 = vmatpush.msrb.mxu0 %v271_v46  ;;  %v573_v46 = vld [vmem:[%s944_s6 + $0xe8] sm:$0xff] }
  0x40   :  { %416 = vmatpush.msrb.mxu1 %v573_v46 }
  0x41   :  { %316 = vmatpush.msrb.mxu0 %v270_v47  ;;  %v572_v47 = vld [vmem:[%s944_s6 + $0xe0] sm:$0xff] }
  0x42   :  { %417 = vmatpush.msrb.mxu1 %v572_v47 }
  0x43   :  { %317 = vmatpush.msrb.mxu0 %v269_v48  ;;  %v392_v48 = vld [vmem:[%s944_s6 + $0x78] sm:$0xff] }
  0x44   :  { %443 = vmatpush.msrb.mxu2 %v392_v48 }
  0x45   :  { %318 = vmatpush.msrb.mxu0 %v268_v49  ;;  %v591_v49 = vld [vmem:[%s944_s6 + $0x178] sm:$0xff] }
  0x46   :  { %493 = vmatpush.msrb.mxu3 %v591_v49  ;;  %v348_v49 = vld [vmem:[%s943_s5] sm:$0x1] }
  0x47   :  { %319 = vmatpush.msrb.mxu0 %v267_v50  ;;  %v571_v50 = vld [vmem:[%s944_s6 + $0xd8] sm:$0xff] }
  0x48   :  { %418 = vmatpush.msrb.mxu1 %v571_v50 }
  0x49   :  { %320 = vmatpush.msrb.mxu0 %v266_v51  ;;  %v391_v51 = vld [vmem:[%s944_s6 + $0x70] sm:$0xff] }
  0x4a   :  { %444 = vmatpush.msrb.mxu2 %v391_v51 }
  0x4b   :  { %321 = vmatpush.msrb.mxu0 %v265_v52  ;;  %v590_v52 = vld [vmem:[%s944_s6 + $0x170] sm:$0xff] }
  0x4c   :  { %494 = vmatpush.msrb.mxu3 %v590_v52 }
  0x4d   :  { %322 = vmatpush.msrb.mxu0 %v264_v53  ;;  %v570_v53 = vld [vmem:[%s944_s6 + $0xd0] sm:$0xff] }
  0x4e   :  { %419 = vmatpush.msrb.mxu1 %v570_v53 }
  0x4f   :  { %323 = vmatpush.msrb.mxu0 %v263_v54  ;;  %v390_v54 = vld [vmem:[%s944_s6 + $0x68] sm:$0xff] }
  0x50   :  { %445 = vmatpush.msrb.mxu2 %v390_v54 }
  0x51   :  { %324 = vmatpush.msrb.mxu0 %v262_v55  ;;  %v589_v55 = vld [vmem:[%s944_s6 + $0x168] sm:$0xff] }
  0x52   :  { %495 = vmatpush.msrb.mxu3 %v589_v55 }
  0x53   :  { %325 = vmatpush.msrb.mxu0 %v261_v56  ;;  %v569_v56 = vld [vmem:[%s944_s6 + $0xc8] sm:$0xff] }
  0x54   :  { %420 = vmatpush.msrb.mxu1 %v569_v56 }
  0x9b   :  { %v170_v57 = vpop.f32.mrf.mxu1 }
  0x9f   :  { %v129_v58 = vpop.f32.mrf.mxu3 }
  0xa0   :  { %v224_v59 = vpop.f32.mrf.mxu2  ;;  %v171_v0 = vadd.f32 %v170_v57, %v129_v58  ;;  %v389_v57 = vld [vmem:[%s944_s6 + $0x60] sm:$0xff] }
  0xa1   :  { %v588_v58 = vld [vmem:[%s944_s6 + $0x160] sm:$0xff]  ;;  %446 = vmatpush.msrb.mxu2 %v389_v57 }
  0xa2   :  { %v236_v5 = vadd.f32 %v224_v59, %v171_v0  ;;  %v568_v59 = vld [vmem:[%s944_s6 + $0xc0] sm:$0xff]  ;;  %496 = vmatpush.msrb.mxu3 %v588_v58  ;;  %v387_v0 = vld [vmem:[%s944_s6 + $0x50] sm:$0xff] }
  0xa3   :  { %v173_v60 = vpop.f32.mrf.mxu1  ;;  %421 = vmatpush.msrb.mxu1 %v568_v59 }
  0xa4   :  { %v244_v10 = vadd.f32 %v597_v6, %v236_v5  ;;  %v565_v5 = vld [vmem:[%s944_s6 + $0xa8] sm:$0xff] }
  0xa6   :  { %v746_v16 = vmax.f32 %v244_v10, 0.0 }
  0xa7   :  { %v132_v61 = vpop.f32.mrf.mxu3 }
  0xa8   :  { %v227_v62 = vpop.f32.mrf.mxu2  ;;  %v174_v63 = vadd.f32 %v173_v60, %v132_v61  ;;  %v297_v21 = vmul.f32 %v746_v16, %v746_v16  ;;  %v388_v61 = vld [vmem:[%s944_s6 + $0x58] sm:$0xff] }
  0xa9   :  { %447 = vmatpush.msrb.mxu2 %v388_v61 }
  0xaa   :  { %v237_v2 = vadd.f32 %v227_v62, %v174_v63  ;;  %v587_v62 = vld [vmem:[%s944_s6 + $0x158] sm:$0xff] }
  0xab   :  { %v176_v1 = vpop.f32.mrf.mxu1  ;;  %v567_v63 = vld [vmem:[%s944_s6 + $0xb8] sm:$0xff]  ;;  %497 = vmatpush.msrb.mxu3 %v587_v62  ;;  %448 = vmatpush.msrb.mxu2 %v387_v0 }
  0xac   :  { %v245_v8 = vadd.f32 %v597_v6, %v237_v2  ;;  %422 = vmatpush.msrb.mxu1 %v567_v63  ;;  %v566_v2 = vld [vmem:[%s944_s6 + $0xb0] sm:$0xff] }
  0xae   :  { %v744_v13 = vmax.f32 %v245_v8, 0.0  ;;  %423 = vmatpush.msrb.mxu1 %v566_v2  ;;  %v584_v8 = vld [vmem:[%s944_s6 + $0x140] sm:$0xff] }
  0xaf   :  { %v135_v3 = vpop.f32.mrf.mxu3 }
  0xb0   :  { %v230_v4 = vpop.f32.mrf.mxu2  ;;  %v177_v7 = vadd.f32 %v176_v1, %v135_v3  ;;  %v298_v19 = vmul.f32 %v744_v13, %v744_v13  ;;  %v252_v22 = vadd.f32 %v744_v13, %v746_v16  ;;  %v586_v1 = vld [vmem:[%s944_s6 + $0x150] sm:$0xff]  ;;  %v386_v3 = vld [vmem:[%s944_s6 + $0x48] sm:$0xff]  ;;  %424 = vmatpush.msrb.mxu1 %v565_v5 }
  0xb1   :  { %498 = vmatpush.msrb.mxu3 %v586_v1  ;;  %449 = vmatpush.msrb.mxu2 %v386_v3 }
  0xb2   :  { %v238_v9 = vadd.f32 %v230_v4, %v177_v7  ;;  %v301_v25 = vadd.f32 %v298_v19, %v297_v21  ;;  %v585_v4 = vld [vmem:[%s944_s6 + $0x148] sm:$0xff]  ;;  %v385_v7 = vld [vmem:[%s944_s6 + $0x40] sm:$0xff]  ;;  %v383_v19 = vld [vmem:[%s944_s6 + $0x30] sm:$0xff] }
  0xb3   :  { %v179_v12 = vpop.f32.mrf.mxu1  ;;  %499 = vmatpush.msrb.mxu3 %v585_v4  ;;  %450 = vmatpush.msrb.mxu2 %v385_v7  ;;  %v562_v21 = vld [vmem:[%s944_s6 + $0x90] sm:$0xff] }
  0xb4   :  { %v246_v11 = vadd.f32 %v597_v6, %v238_v9  ;;  %v564_v9 = vld [vmem:[%s944_s6 + $0xa0] sm:$0xff] }
  0xb5   :  { %500 = vmatpush.msrb.mxu3 %v584_v8  ;;  %425 = vmatpush.msrb.mxu1 %v564_v9 }
  0xb6   :  { %v748_v17 = vmax.f32 %v246_v11, 0.0  ;;  %v384_v11 = vld [vmem:[%s944_s6 + $0x38] sm:$0xff] }
  0xb7   :  { %v138_v14 = vpop.f32.mrf.mxu3  ;;  %451 = vmatpush.msrb.mxu2 %v384_v11 }
  0xb8   :  { %v233_v15 = vpop.f32.mrf.mxu2  ;;  %v180_v18 = vadd.f32 %v179_v12, %v138_v14  ;;  %v299_v23 = vmul.f32 %v748_v17, %v748_v17  ;;  %v253_v26 = vadd.f32 %v252_v22, %v748_v17  ;;  %v583_v12 = vld [vmem:[%s944_s6 + $0x138] sm:$0xff] }
  0xb9   :  { %v563_v14 = vld [vmem:[%s944_s6 + $0x98] sm:$0xff]  ;;  %501 = vmatpush.msrb.mxu3 %v583_v12  ;;  %452 = vmatpush.msrb.mxu2 %v383_v19 }
  0xba   :  { %v239_v20 = vadd.f32 %v233_v15, %v180_v18  ;;  %v302_v28 = vadd.f32 %v301_v25, %v299_v23  ;;  %426 = vmatpush.msrb.mxu1 %v563_v14  ;;  %v382_v23 = vld [vmem:[%s944_s6 + $0x28] sm:$0xff] }
  0xbb   :  { %v561_v25 = vld [vmem:[%s944_s6 + $0x88] sm:$0xff]  ;;  %453 = vmatpush.msrb.mxu2 %v382_v23 }
  0xbc   :  { %v247_v24 = vadd.f32 %v597_v6, %v239_v20  ;;  %v582_v20 = vld [vmem:[%s944_s6 + $0x130] sm:$0xff]  ;;  %427 = vmatpush.msrb.mxu1 %v562_v21 }
  0xbd   :  { %502 = vmatpush.msrb.mxu3 %v582_v20 }
  0xbe   :  { %v759_v27 = vmax.f32 %v247_v24, 0.0  ;;  %v581_v24 = vld [vmem:[%s944_s6 + $0x128] sm:$0xff]  ;;  %428 = vmatpush.msrb.mxu1 %v561_v25 }
  0xbf   :  { %503 = vmatpush.msrb.mxu3 %v581_v24 }
  0xc0   :  { %v300_v29 = vmul.f32 %v759_v27, %v759_v27  ;;  %v254_v30 = vadd.f32 %v253_v26, %v759_v27 }
  0xc2   :  { %v303_v31 = vadd.f32 %v302_v28, %v300_v29  ;;  %v255_v32 = vrot.slane %v254_v30, 4  ;;  %v381_v28 = vld [vmem:[%s944_s6 + $0x20] sm:$0xff] }
  0xc3   :  { %v580_v29 = vld [vmem:[%s944_s6 + $0x120] sm:$0xff]  ;;  %454 = vmatpush.msrb.mxu2 %v381_v28 }
  0xc4   :  { %v256_v33 = vadd.f32 %v255_v32, %v254_v30  ;;  %v304_v34 = vrot.slane %v303_v31, 4  ;;  %v560_v30 = vld [vmem:[%s944_s6 + $0x80] sm:$0xff]  ;;  %504 = vmatpush.msrb.mxu3 %v580_v29  ;;  %v380_v32 = vld [vmem:[%s944_s6 + $0x18] sm:$0xff] }
  0xc5   :  { %429 = vmatpush.msrb.mxu1 %v560_v30  ;;  %455 = vmatpush.msrb.mxu2 %v380_v32 }
  0xc6   :  { %v257_v35 = vrot.slane %v256_v33, 2  ;;  %v305_v36 = vadd.f32 %v304_v34, %v303_v31  ;;  %v379_v34 = vld [vmem:[%s944_s6 + $0x10] sm:$0xff] }
  0xc7   :  { %456 = vmatpush.msrb.mxu2 %v379_v34 }
  0xc8   :  { %v258_v37 = vadd.f32 %v257_v35, %v256_v33  ;;  %v306_v38 = vrot.slane %v305_v36, 2  ;;  %v579_v33 = vld [vmem:[%s944_s6 + $0x118] sm:$0xff]  ;;  %v578_v35 = vld [vmem:[%s944_s6 + $0x110] sm:$0xff] }
  0xc9   :  { %505 = vmatpush.msrb.mxu3 %v579_v33 }
  0xca   :  { %v259_v39 = vrot.slane %v258_v37, 1  ;;  %v307_v41 = vadd.f32 %v306_v38, %v305_v36  ;;  %v378_v36 = vld [vmem:[%s944_s6 + $0x8] sm:$0xff]  ;;  %v377_v38 = vld [vmem:[%s944_s6] sm:$0xff] }
  0xcb   :  { %506 = vmatpush.msrb.mxu3 %v578_v35  ;;  %457 = vmatpush.msrb.mxu2 %v378_v36 }
  0xcc   :  { %v260_v40 = vadd.f32 %v259_v39, %v258_v37  ;;  %v308_v42 = vrot.slane %v307_v41, 1  ;;  %v577_v37 = vld [vmem:[%s944_s6 + $0x108] sm:$0xff]  ;;  %v576_v39 = vld [vmem:[%s944_s6 + $0x100] sm:$0xff] }
  0xcd   :  { %507 = vmatpush.msrb.mxu3 %v577_v37  ;;  %458 = vmatpush.msrb.mxu2 %v377_v38 }
  0xce   :  { %293 = vmatmul.f32.vlgmr.msra.gmra.mxu0 %v260_v40  ;;  %v309_v43 = vadd.f32 %v308_v42, %v307_v41 }
  0xcf   :  { %508 = vmatpush.msrb.mxu3 %v576_v39 }
  0xd6   :  { %326 = vmatmul.f32.vlgmr.msrb.gmra.mxu0 %v309_v43 }
 0x14b   :  { %v294_v60 = vpop.f32.mrf.mxu0 }
 0x14c   :  { %v839_v6 = vmul.f32 0.001953125, %v294_v60 }
 0x14e   :  { %v332_v15 = vmul.f32 %v839_v6, %v839_v6 }
 0x153   :  { %v327_v10 = vpop.f32.mrf.mxu0 }
 0x154   :  { %v331_v18 = vmul.f32 0.001953125, %v327_v10 }
 0x156   :  { %v333_v22 = vsub.f32 %v331_v18, %v332_v15 }
 0x158   :  { %v334_v26 = vmax.f32 %v333_v22, 0.0 }
 0x15a   :  { %v336_v31 = vadd.f32 1e-05, %v334_v26 }
 0x15c   :  { %599 = vrsqrt.f32 %v336_v31  ;;  %vm343_vm3 = vweird.f32 %v336_v31 }
 0x162   :  { %v600_v40 = vpop.eup %599 }
 0x163   :  { %v338_v41 = vmul.f32 %v600_v40, %v336_v31  ;;  %vm344_vm2 = vweird.f32 %v600_v40 }
 0x164   :  { %vm345_vm4 = vmor %vm343_vm3, %vm344_vm2 }
 0x165   :  { %v339_v42 = vmul.f32 %v600_v40, %v338_v41 }
 0x167   :  { %v340_v43 = vmul.f32 0.5, %v339_v42 }
 0x169   :  { %v341_v44 = vsub.f32 1.5, %v340_v43 }
 0x16b   :  { %v342_v46 = vmul.f32 %v600_v40, %v341_v44 }
 0x16d   :  { %v346_v47 = vsel %vm345_vm4, %v600_v40, %v342_v46 }
 0x16e   :  { %v347_v48 = vmul.f32 %v346_v47, %v335_v45 }
 0x170   :  { %v349_v50 = vmul.f32 %v347_v48, %v839_v6  ;;  %v356_v51 = vperm.slane %v347_v48, 0  ;;  %v598_v6 = vld [vmem:[%s945_s7] ss:$0 sm:$0xff] }
 0x172   :  { %v350_v52 = vsub.f32 %v348_v49, %v349_v50  ;;  %v358_v53 = vmul.f32 %v356_v51, %v746_v16  ;;  %v359_v54 = vmul.f32 %v356_v51, %v744_v13  ;;  %v360_v55 = vmul.f32 %v356_v51, %v748_v17 }
 0x173   :  { %v361_v57 = vmul.f32 %v356_v51, %v759_v27 }
 0x174   :  { %v363_v56 = vperm.slane %v350_v52, 0 }
 0x176   :  { %v365_v58 = vadd.f32 %v363_v56, %v358_v53  ;;  %v366_v59 = vadd.f32 %v363_v56, %v359_v54  ;;  %v367_v60 = vadd.f32 %v363_v56, %v360_v55  ;;  %v368_v61 = vadd.f32 %v363_v56, %v361_v57 }
 0x178   :  { %369 = vst [vmem:[#allocation3 + $0x1] sm:$0xff] %v365_v58  ;;  %430 = vmatmul.f32.vlgmr.msrb.gmra.mxu1 %v365_v58 }
 0x179   :  { %370 = vst [vmem:[#allocation3 + $0x9] sm:$0xff] %v366_v59 }
 0x17a   :  { %371 = vst [vmem:[#allocation3 + $0x19] sm:$0xff] %v367_v60 }
 0x17b   :  { %372 = vst [vmem:[#allocation3 + $0x21] sm:$0xff] %v368_v61 }
 0x17f   :  { %v373_v62 = vld [vmem:[#allocation3] sm:$0xff] }
 0x180   :  { %459 = vmatmul.f32.vlgmr.msrb.gmra.mxu2 %v373_v62  ;;  %v472_v63 = vld [vmem:[#allocation3 + $0x2] sm:$0xff]  ;;  %433 = vmatmul.f32.gmra.mxu1 %v366_v59  ;;  %v473_v16 = vld [vmem:[#allocation3 + $0xa] sm:$0xff] }
 0x181   :  { %509 = vmatmul.f32.vlgmr.msrb.gmra.mxu3 %v472_v63  ;;  %v374_v13 = vld [vmem:[#allocation3 + $0x8] sm:$0xff]  ;;  %v375_v17 = vld [vmem:[#allocation3 + $0x18] sm:$0xff] }
 0x182   :  { %v474_v27 = vld [vmem:[#allocation3 + $0x1a] sm:$0xff]  ;;  %v475_v1 = vld [vmem:[#allocation3 + $0x22] sm:$0xff] }
 0x183   :  { %v376_v0 = vld [vmem:[#allocation3 + $0x20] sm:$0xff] }
 0x188   :  { %462 = vmatmul.f32.gmra.mxu2 %v374_v13  ;;  %436 = vmatmul.f32.gmra.mxu1 %v367_v60 }
 0x189   :  { %512 = vmatmul.f32.gmra.mxu3 %v473_v16 }
 0x190   :  { %465 = vmatmul.f32.gmra.mxu2 %v375_v17  ;;  %439 = vmatmul.f32.gmra.mxu1 %v368_v61 }
 0x191   :  { %515 = vmatmul.f32.gmra.mxu3 %v474_v27 }
 0x198   :  { %468 = vmatmul.f32.gmra.mxu2 %v376_v0 }
 0x199   :  { %518 = vmatmul.f32.gmra.mxu3 %v475_v1 }
 0x1f5   :  { %v431_v2 = vpop.f32.mrf.mxu1 }
 0x1fd   :  { %v434_v8 = vpop.f32.mrf.mxu1 }
 0x203   :  { %v460_v3 = vpop.f32.mrf.mxu2 }
 0x204   :  { %v461_v4 = vadd.f32 %v460_v3, %v431_v2  ;;  %v510_v5 = vpop.f32.mrf.mxu3 }
 0x205   :  { %v437_v19 = vpop.f32.mrf.mxu1 }
 0x206   :  { %v522_v7 = vadd.f32 %v510_v5, %v461_v4 }
 0x208   :  { %v530_v9 = vadd.f32 %v598_v6, %v522_v7 }
 0x20a   :  { %v534_v10 = vmax.f32 %v530_v9, 0.0 }
 0x20b   :  { %v463_v11 = vpop.f32.mrf.mxu2 }
 0x20c   :  { %538 = vst [vmem:[%s946_s8] sm:$0xff] %v534_v10  ;;  %v464_v12 = vadd.f32 %v463_v11, %v434_v8  ;;  %v513_v14 = vpop.f32.mrf.mxu3 }
 0x20d   :  { %v440_v28 = vpop.f32.mrf.mxu1 }
 0x20e   :  { %v523_v15 = vadd.f32 %v513_v14, %v464_v12 }
 0x210   :  { %v531_v18 = vadd.f32 %v598_v6, %v523_v15 }
 0x212   :  { %v535_v20 = vmax.f32 %v531_v18, 0.0 }
 0x213   :  { %v466_v21 = vpop.f32.mrf.mxu2 }
 0x214   :  { %539 = vst [vmem:[%s946_s8 + $0x8] sm:$0xff] %v535_v20  ;;  %v467_v22 = vadd.f32 %v466_v21, %v437_v19  ;;  %v516_v23 = vpop.f32.mrf.mxu3 }
 0x216   :  { %v524_v24 = vadd.f32 %v516_v23, %v467_v22 }
 0x218   :  { %v532_v25 = vadd.f32 %v598_v6, %v524_v24 }
 0x21a   :  { %v536_v26 = vmax.f32 %v532_v25, 0.0 }
 0x21b   :  { %v469_v29 = vpop.f32.mrf.mxu2 }
 0x21c   :  { %540 = vst [vmem:[%s946_s8 + $0x10] sm:$0xff] %v536_v26  ;;  %v470_v30 = vadd.f32 %v469_v29, %v440_v28  ;;  %v519_v31 = vpop.f32.mrf.mxu3 }
 0x21e   :  { %v525_v32 = vadd.f32 %v519_v31, %v470_v30 }
 0x220   :  { %v533_v33 = vadd.f32 %v598_v6, %v525_v32 }
 0x222   :  { %v537_v34 = vmax.f32 %v533_v33, 0.0 }
 0x224   :  { %541 = vst [vmem:[%s946_s8 + $0x18] sm:$0xff] %v537_v34 }
 0x225   :  { %546 = vsyncpa [#allocation5], 1 }
 0x226   :  { %547 = vsyncpa [#allocation7], 1 }

</bundles_post_ra>
